<compile_context>
chip_gen: v6e
topology: v6e:2x2x1
jax: 0.10.0
libtpu: 0.0.40
codegen_flags: <defaults>
</compile_context>

<pallas_src>
import functools

import jax
import jax.numpy as jnp
from jax.experimental import pallas as pl
from jax.experimental.pallas import tpu as pltpu

_EPS = 1e-5

# Tile-picker budget for pipelined buffers + temps; sized for v7x's 64 MiB VMEM
# (also a big step up from the old 8 MiB budget on v5e/v6e).
_VMEM_BUDGET_BYTES = 32 * 1024 * 1024
_VMEM_LIMIT_BYTES = 48 * 1024 * 1024
_LANE_CAP = 16384  # max spatial tile (lanes)


def _ln_withbias_kernel(x_ref, w_ref, b_ref, o_ref):
    # x_ref: (Bt, C, TS); w_ref, b_ref: (1, C, 1), already f32.
    x = x_ref[...].astype(jnp.float32)
    mu = jnp.mean(x, axis=1, keepdims=True)            # (Bt, 1, TS)
    msq = jnp.mean(x * x, axis=1, keepdims=True)       # one-pass variance
    var = jnp.maximum(msq - mu * mu, 0.0)              # var(unbiased=False)
    inv = jax.lax.rsqrt(var + _EPS)
    y = (x - mu) * inv * w_ref[...] + b_ref[...]
    o_ref[...] = y.astype(o_ref.dtype)


def _ln_biasfree_kernel(x_ref, w_ref, o_ref):
    # BiasFree divides x (NOT x - mu) by sqrt(var + eps); never materialize x - mu.
    x = x_ref[...].astype(jnp.float32)
    mu = jnp.mean(x, axis=1, keepdims=True)
    msq = jnp.mean(x * x, axis=1, keepdims=True)
    var = jnp.maximum(msq - mu * mu, 0.0)
    inv = jax.lax.rsqrt(var + _EPS)
    o_ref[...] = (x * inv * w_ref[...]).astype(o_ref.dtype)


def _round_up(n: int, m: int) -> int:
    return ((n + m - 1) // m) * m


def _pick_tiles(B: int, C: int, HW: int, itemsize: int):
    """Pick (Bt, TS) batch/spatial block sizes, dtype- and VMEM-aware."""
    # Sublane packing: 8 rows for 4-byte dtypes, 16 for 2-byte (bf16), etc.
    sublane = max(8, 32 // max(itemsize, 1))
    c_pad = _round_up(C, sublane)
    # Per lane-column (one spatial position of one batch element):
    #   2x in + 2x out pipeline buffers in the input dtype, ~3 f32 temps.
    bytes_per_col = (4 * itemsize + 3 * 4) * c_pad
    elems_cap = max(128, _VMEM_BUDGET_BYTES // bytes_per_col)  # max Bt * TS

    if HW <= elems_cap:
        ts = HW                                   # full extent (legal block dim)
    else:
        ts = max(128, min(_LANE_CAP, (elems_cap // 128) * 128))

    bt = max(1, min(B, elems_cap // max(ts, 1)))

    # Ensure at least 2 grid steps when possible (v7x has 2 TensorCores).
    if pl.cdiv(B, bt) * pl.cdiv(HW, ts) < 2:
        if B >= 2:
            bt = pl.cdiv(B, 2)
        elif HW > 128 and ts == HW:
            ts2 = _round_up(pl.cdiv(HW, 2), 128)  # TS < HW must be mult. of 128
            if ts2 < HW:
                ts = ts2
    return bt, ts


@functools.partial(jax.jit, static_argnames=("layer_norm_type",))
def layernorm_restormer(x, weight, bias, layer_norm_type="BiasWith"):
    """x: [B, C, H, W] (NCHW, matching the PyTorch module). Returns NCHW."""
    B, C, H, W = x.shape
    HW = H * W

    # Free reshape: NCHW -> [B, C, H*W]; spatial on lanes, C on sublanes.
    x3 = x.reshape(B, C, HW)

    itemsize = jnp.dtype(x.dtype).itemsize
    Bt, TS = _pick_tiles(B, C, HW, itemsize)
    grid = (pl.cdiv(B, Bt), pl.cdiv(HW, TS))

    # Pre-cast params to f32 once in the wrapper (kernel math is f32).
    w3 = weight.astype(jnp.float32).reshape(1, C, 1)
    b3 = bias.astype(jnp.float32).reshape(1, C, 1)

    x_spec = pl.BlockSpec((Bt, C, TS), lambda bi, si: (bi, 0, si))
    p_spec = pl.BlockSpec((1, C, 1), lambda bi, si: (0, 0, 0))
    o_spec = pl.BlockSpec((Bt, C, TS), lambda bi, si: (bi, 0, si))

    cparams = pltpu.CompilerParams(
        dimension_semantics=("parallel", "parallel"),
        vmem_limit_bytes=_VMEM_LIMIT_BYTES,
    )

    if layer_norm_type in ("BiasWith", "WithBias"):
        kernel = _ln_withbias_kernel
        in_specs = [x_spec, p_spec, p_spec]
        args = (x3, w3, b3)
    elif layer_norm_type == "BiasFree":
        kernel = _ln_biasfree_kernel
        in_specs = [x_spec, p_spec]
        args = (x3, w3)
    else:
        raise ValueError(f"unknown LayerNorm_type: {layer_norm_type}")

    out3 = pl.pallas_call(
        kernel,
        out_shape=jax.ShapeDtypeStruct((B, C, HW), x.dtype),
        grid_spec=pltpu.PrefetchScalarGridSpec(
            num_scalar_prefetch=0,
            grid=grid,
            in_specs=in_specs,
            out_specs=o_spec,
        ),
        compiler_params=cparams,
    )(*args)

    # Free reshape back: [B, C, H*W] -> NCHW.
    return out3.reshape(B, C, H, W)


def _reference(x, weight, bias, layer_norm_type="BiasWith"):
    """Pure-JAX reference matching the PyTorch forward exactly."""
    B, C, H, W = x.shape
    x3 = jnp.transpose(x, (0, 2, 3, 1)).reshape(B, H * W, C)  # to_3d
    if layer_norm_type in ("BiasWith", "WithBias"):
        mu = jnp.mean(x3, axis=-1, keepdims=True)
        var = jnp.var(x3, axis=-1, keepdims=True)
        y3 = (x3 - mu) / jnp.sqrt(var + 1e-5) * weight + bias
    else:
        var = jnp.var(x3, axis=-1, keepdims=True)
        y3 = x3 / jnp.sqrt(var + 1e-5) * weight
    return jnp.transpose(y3.reshape(B, H, W, C), (0, 3, 1, 2))  # to_4d


if __name__ == "__main__":
    key = jax.random.PRNGKey(0)
    B, C, H, W = 2, 4, 16, 16
    x = jax.random.normal(key, (B, C, H, W), dtype=jnp.float32)

    # deterministic parameter init matching nn.Parameter(torch.ones/zeros(dim))
    weight = jnp.ones((C,), dtype=jnp.float32)
    bias = jnp.zeros((C,), dtype=jnp.float32)

    # WithBias path (module default 'BiasWith')
    out = layernorm_restormer(x, weight, bias, layer_norm_type="BiasWith")
    out = jax.block_until_ready(out)
    ref = _reference(x, weight, bias, layer_norm_type="BiasWith")
    assert out.shape == (B, C, H, W)
    assert jnp.allclose(out, ref, atol=2e-5, rtol=2e-5), "WithBias mismatch vs reference"

    # BiasFree path
    out_bf = layernorm_restormer(x, weight, bias, layer_norm_type="BiasFree")
    out_bf = jax.block_until_ready(out_bf)
    ref_bf = _reference(x, weight, bias, layer_norm_type="BiasFree")
    assert jnp.allclose(out_bf, ref_bf, atol=2e-5, rtol=2e-5), "BiasFree mismatch vs reference"

    print("KERNEL_OK")
</pallas_src>

<mosaic_0001>
module attributes {stable_mosaic.version = 11 : i64} {
  func.func @_ln_withbias_kernel(%arg0: i32, %arg1: i32, %arg2: memref<1x4x256xf32, #tpu.memory_space<vmem>>, %arg3: memref<1x4x1xf32, #tpu.memory_space<vmem>>, %arg4: memref<1x4x1xf32, #tpu.memory_space<vmem>>, %arg5: memref<1x4x256xf32, #tpu.memory_space<vmem>>) attributes {dimension_semantics = [#tpu.dimension_semantics<parallel>, #tpu.dimension_semantics<parallel>], iteration_bounds = array<i64: 2, 1>, scalar_prefetch = 0 : i64, scratch_operands = 0 : i64, tpu.core_type = #tpu.core_type<tc>, window_params = [{transform_indices = @transform_0, window_bounds = array<i64: 1, 4, 256>}, {pipeline_mode = #tpu.pipeline_mode<synchronous>, transform_indices = @transform_1, window_bounds = array<i64: 1, 4, 1>}, {pipeline_mode = #tpu.pipeline_mode<synchronous>, transform_indices = @transform_2, window_bounds = array<i64: 1, 4, 1>}, {transform_indices = @transform_3, window_bounds = array<i64: 1, 4, 256>}]} {
    %c0 = arith.constant 0 : index
    %c0_0 = arith.constant 0 : index
    %c0_1 = arith.constant 0 : index
    %0 = vector.load %arg2[%c0, %c0_0, %c0_1] : memref<1x4x256xf32, #tpu.memory_space<vmem>>, vector<1x4x256xf32>
    %cst = arith.constant dense<0.000000e+00> : vector<1x256xf32>
    %1 = vector.multi_reduction <add>, %0, %cst [1] : vector<1x4x256xf32> to vector<1x256xf32>
    %2 = vector.shape_cast %1 : vector<1x256xf32> to vector<1x1x256xf32>
    %cst_2 = arith.constant 4.000000e+00 : f32
    %3 = vector.broadcast %cst_2 : f32 to vector<1x1x256xf32>
    %4 = arith.divf %2, %3 : vector<1x1x256xf32>
    %5 = arith.mulf %0, %0 : vector<1x4x256xf32>
    %cst_3 = arith.constant dense<0.000000e+00> : vector<1x256xf32>
    %6 = vector.multi_reduction <add>, %5, %cst_3 [1] : vector<1x4x256xf32> to vector<1x256xf32>
    %7 = vector.shape_cast %6 : vector<1x256xf32> to vector<1x1x256xf32>
    %cst_4 = arith.constant 4.000000e+00 : f32
    %8 = vector.broadcast %cst_4 : f32 to vector<1x1x256xf32>
    %9 = arith.divf %7, %8 : vector<1x1x256xf32>
    %10 = arith.mulf %4, %4 : vector<1x1x256xf32>
    %11 = arith.subf %9, %10 : vector<1x1x256xf32>
    %cst_5 = arith.constant 0.000000e+00 : f32
    %12 = vector.broadcast %cst_5 : f32 to vector<1x1x256xf32>
    %13 = arith.maximumf %11, %12 : vector<1x1x256xf32>
    %cst_6 = arith.constant 9.99999974E-6 : f32
    %14 = vector.broadcast %cst_6 : f32 to vector<1x1x256xf32>
    %15 = arith.addf %13, %14 : vector<1x1x256xf32>
    %16 = math.rsqrt %15 : vector<1x1x256xf32>
    %17 = vector.broadcast %4 : vector<1x1x256xf32> to vector<1x4x256xf32>
    %18 = arith.subf %0, %17 : vector<1x4x256xf32>
    %19 = vector.broadcast %16 : vector<1x1x256xf32> to vector<1x4x256xf32>
    %20 = arith.mulf %18, %19 : vector<1x4x256xf32>
    %c0_7 = arith.constant 0 : index
    %c0_8 = arith.constant 0 : index
    %c0_9 = arith.constant 0 : index
    %21 = vector.load %arg3[%c0_7, %c0_8, %c0_9] : memref<1x4x1xf32, #tpu.memory_space<vmem>>, vector<1x4x1xf32>
    %22 = vector.broadcast %21 : vector<1x4x1xf32> to vector<1x4x256xf32>
    %23 = arith.mulf %20, %22 : vector<1x4x256xf32>
    %c0_10 = arith.constant 0 : index
    %c0_11 = arith.constant 0 : index
    %c0_12 = arith.constant 0 : index
    %24 = vector.load %arg4[%c0_10, %c0_11, %c0_12] : memref<1x4x1xf32, #tpu.memory_space<vmem>>, vector<1x4x1xf32>
    %25 = vector.broadcast %24 : vector<1x4x1xf32> to vector<1x4x256xf32>
    %26 = arith.addf %23, %25 : vector<1x4x256xf32>
    %c0_13 = arith.constant 0 : index
    %c0_14 = arith.constant 0 : index
    %c0_15 = arith.constant 0 : index
    %27 = vector.load %arg5[%c0_13, %c0_14, %c0_15] : memref<1x4x256xf32, #tpu.memory_space<vmem>>, vector<1x4x256xf32>
    tpu.vector_store %arg5[%c0_13, %c0_14, %c0_15], %26 {strides = array<i32>} : memref<1x4x256xf32, #tpu.memory_space<vmem>>, vector<1x4x256xf32>,
    return
  }
  func.func @transform_0(%arg0: i32, %arg1: i32) -> (i32, i32, i32) {
    %c0_i32 = arith.constant 0 : i32
    %c0_i32_0 = arith.constant 0 : i32
    return %arg0, %c0_i32, %arg1 : i32, i32, i32
  }
  func.func @transform_1(%arg0: i32, %arg1: i32) -> (i32, i32, i32) {
    %c0_i32 = arith.constant 0 : i32
    %c0_i32_0 = arith.constant 0 : i32
    %c0_i32_1 = arith.constant 0 : i32
    %c0_i32_2 = arith.constant 0 : i32
    return %c0_i32, %c0_i32_0, %c0_i32_1 : i32, i32, i32
  }
  func.func @transform_2(%arg0: i32, %arg1: i32) -> (i32, i32, i32) {
    %c0_i32 = arith.constant 0 : i32
    %c0_i32_0 = arith.constant 0 : i32
    %c0_i32_1 = arith.constant 0 : i32
    %c0_i32_2 = arith.constant 0 : i32
    return %c0_i32, %c0_i32_0, %c0_i32_1 : i32, i32, i32
  }
  func.func @transform_3(%arg0: i32, %arg1: i32) -> (i32, i32, i32) {
    %c0_i32 = arith.constant 0 : i32
    %c0_i32_0 = arith.constant 0 : i32
    return %arg0, %c0_i32, %arg1 : i32, i32, i32
  }
}

</mosaic_0001>

<bundles_post_ra>
// kernel: layernorm_restormer.1
= control target key start
LH: loop header
LB: loop body
LE: loop exit
PB: predicated region body
PF: predicated region fallthrough
CT: control target
= control target key end

     0   :  { %s479_s12 = smov 0   ;;  %s481_s13 = smov 0   ;;  %s525_s0 = inlined_call_operand.vmem [shape: f32[2,4,256], index: 0, kind: input, shape index: {}]   ;;  %s526_s1 = inlined_call_operand.vmem [shape: f32[1,4,1], index: 1, kind: input, shape index: {}]   ;;  %s527_s2 = inlined_call_operand.vmem [shape: f32[1,4,1], index: 2, kind: input, shape index: {}]   ;;  %s528_s3 = inlined_call_operand.vmem [shape: f32[2,4,256], index: 3, kind: output, shape index: {}]  }
   0x1   :  { %s483_s14 = smov 0  }
   0x2 LB: > { %s25_s15 = sadd.s32 1, %s451_s13  ;;  %p392_p0 = scmp.ge.s32.totalorder %s455_s14, 1  ;;  %s455_s14 = sphi %s483_s14, %s13_s14   ;;  %s451_s13 = sphi %s481_s13, %s530_s13   ;;  %s447_s12 = sphi %s479_s12, %s529_s12  }
   0x3   : > { %p27_p1 = scmp.ge.s32.totalorder %s25_s15, 2  ;;  %p158_p2 = scmp.lt.s32.totalorder %s455_s14, 3 }
   0x5   : > { %s532_s15 = smov (%p27_p1, %s25_s15), 0  ;;  %p159_p3 = pnand %p392_p0, %p158_p2 }
   0x6   : > { %p191_p4 = scmp.lt.s32.totalorder (!%p159_p3), %s447_s12, 1 }
   0x7   : > { %162 = sbr.rel (%p159_p3) target bundleno = 147 (0x93), region = 32 }
   0xc   : > { %v272_v0 = vld [vmem:[%s526_s1] sm:$0xf]  ;;  %v457_v1 = vmov 0   ;;  %s534_s12 = smov (!%p191_p4, %s447_s12), 1  ;;  %vm214_vm0 = vcmask 1043456   ;;  %v280_v49 = vlaneseq }
   0xd   : > { %427 = vset.pattern.permute.xlu0 %v457_v1  ;;  %v286_v2 = vld [vmem:[%s527_s2] sm:$0xf]  ;;  %s399_s20 = sshll.u32 %s534_s12, 3  ;;  %v458_v47 = vmov 839922192  }
   0xe   : > { %275 = vperm.xlu0 %427, %v272_v0   ;;  %s198_s23 = scalar_lea.vmem %s525_s0, %s399_s20  ;;  %v278_v48 = vunpack.c.l.s4 %v458_v47  ;;  %v281_v52 = vshrl.u32 %v280_v49, 7  ;;  %s208_s26 = scalar_lea.vmem %s528_s3, %s399_s20 }
   0xf   : > { %v210_v3 = vld [vmem:[%s198_s23] sm:$0xff] }
  0x10   : > { %v212_v4 = vcombine.high %v210_v3, %v210_v3  ;;  %v232_v5 = vmul.f32 %v210_v3, %v210_v3  ;;  %v215_v6 = vsel %vm214_vm0, %v210_v3, 0.0  ;;  %v279_v51 = vunpack.c.0.s8 %v278_v48 }
  0x11   : > { %v216_v9 = vrot.slane %v215_v6, 4 }
  0x12   : > { %289 = vperm.xlu0 %427, %v286_v2   ;;  %v222_v7 = vsel %vm214_vm0, %v212_v4, 0.0  ;;  %v234_v8 = vcombine.high %v232_v5, %v232_v5  ;;  %v236_v11 = vsel %vm214_vm0, %v232_v5, 0.0  ;;  %v282_v55 = vsub.s32 %v279_v51, %v281_v52 }
  0x13   : > { %v223_v10 = vrot.slane %v222_v7, 4  ;;  %v217_v13 = vadd.f32 %v216_v9, %v215_v6  ;;  %v237_v14 = vrot.slane %v236_v11, 4 }
  0x14   : > { %v243_v12 = vsel %vm214_vm0, %v234_v8, 0.0 }
  0x15   : > { %v224_v15 = vadd.f32 %v223_v10, %v222_v7  ;;  %v244_v16 = vrot.slane %v243_v12, 4  ;;  %v218_v17 = vrot.slane %v217_v13, 2  ;;  %v238_v18 = vadd.f32 %v237_v14, %v236_v11 }
  0x17   : > { %v225_v19 = vrot.slane %v224_v15, 2  ;;  %v245_v20 = vadd.f32 %v244_v16, %v243_v12  ;;  %v219_v21 = vadd.f32 %v218_v17, %v217_v13  ;;  %v239_v22 = vrot.slane %v238_v18, 2 }
  0x19   : > { %v226_v23 = vadd.f32 %v225_v19, %v224_v15  ;;  %v246_v24 = vrot.slane %v245_v20, 2  ;;  %v220_v25 = vrot.slane %v219_v21, 1  ;;  %v240_v26 = vadd.f32 %v239_v22, %v238_v18 }
  0x1b   : > { %v227_v27 = vrot.slane %v226_v23, 1  ;;  %v247_v28 = vadd.f32 %v246_v24, %v245_v20  ;;  %v221_v29 = vadd.f32 %v220_v25, %v219_v21  ;;  %v241_v30 = vrot.slane %v240_v26, 1 }
  0x1d   : > { %v228_v31 = vadd.f32 %v227_v27, %v226_v23  ;;  %v248_v32 = vrot.slane %v247_v28, 1  ;;  %v230_v33 = vmul.f32 0.25, %v221_v29  ;;  %v242_v34 = vadd.f32 %v241_v30, %v240_v26 }
  0x1f   : > { %v231_v35 = vmul.f32 0.25, %v228_v31  ;;  %v249_v36 = vadd.f32 %v248_v32, %v247_v28  ;;  %v250_v37 = vmul.f32 0.25, %v242_v34  ;;  %v252_v38 = vmul.f32 %v230_v33, %v230_v33 }
  0x21   : > { %v251_v39 = vmul.f32 0.25, %v249_v36  ;;  %v253_v40 = vmul.f32 %v231_v35, %v231_v35  ;;  %v254_v41 = vsub.f32 %v250_v37, %v252_v38  ;;  %v264_v53 = vcombine.low %v230_v33, %v231_v35 }
  0x23   : > { %v255_v42 = vsub.f32 %v251_v39, %v253_v40  ;;  %v256_v43 = vmax.f32 %v254_v41, 0.0  ;;  %v266_v56 = vsub.f32 %v210_v3, %v264_v53 }
  0x25   : > { %v257_v44 = vmax.f32 %v255_v42, 0.0  ;;  %v258_v45 = vadd.f32 1e-05, %v256_v43 }
  0x27   : > { %v259_v46 = vadd.f32 1e-05, %v257_v44  ;;  %429 = vrsqrt.f32 %v258_v45 }
  0x29   : > { %431 = vrsqrt.f32 %v259_v46 }
  0x34   : > { %v430_v50 = vpop.eup %429 }
  0x36   : > { %v432_v54 = vpop.eup %431 }
  0x37   : > { %v269_v57 = vcombine.low %v430_v50, %v432_v54 }
  0x39   : > { %v271_v59 = vmul.f32 %v269_v57, %v266_v56 }
  0x89   : > { %v276_v58 = vpop.permute.xlu0 %275 }
  0x8a   : > { %v283_v60 = vrot.slane %v276_v58, %v282_v55 }
  0x8c   : > { %v285_v62 = vmul.f32 %v283_v60, %v271_v59 }
  0x8d   : > { %v290_v61 = vpop.permute.xlu0 %289 }
  0x8e   : > { %v297_v63 = vrot.slane %v290_v61, %v282_v55 }
  0x90   : > { %v299_v0 = vadd.f32 %v297_v63, %v285_v62 }
  0x92   : > { %300 = vst [vmem:[%s208_s26] sm:$0xff] %v299_v0 }
  0x93 PF: > { %s13_s14 = sadd.s32 1, %s455_s14   ;;  %s529_s12 = smov %s451_s13 }
  0x94   : > { %p10_p5 = scmp.ge.s32.totalorder %s13_s14, 4   ;;  %s530_s13 = smov %s532_s15 }
  0x96   :  { %12 = sbr.rel (!%p10_p5) target bundleno = 2 (0x2), region = 62 }

</bundles_post_ra>
